<compile_context>
chip_gen: v7x
topology: tpu7x:2x2x1
jax: 0.10.0
libtpu: 0.0.40
codegen_flags: <defaults>
</compile_context>

<pallas_src>
import functools

import jax
import jax.numpy as jnp
from jax import lax
from jax.experimental import pallas as pl
from jax.experimental.pallas import tpu as pltpu

_CP = 128            # lane-dense padded class dimension
_VMEM_LIMIT = 64 * 1024 * 1024


def _round_up(x, m):
    return ((x + m - 1) // m) * m


# --------------------------- kernel 1: XW = X @ W ---------------------------
def xw_kernel(x_ref, w_ref, o_ref):
    # x_ref: [TK, F] bf16, w_ref: [F, CP] bf16, o_ref: [TK, CP] bf16
    o_ref[...] = jnp.dot(
        x_ref[...], w_ref[...], preferred_element_type=jnp.float32
    ).astype(o_ref.dtype)


# ---------------- kernel 2: out = log_softmax(A_hat @ XW + b) ---------------
def sgc_agg_kernel(a_ref, xw_ref, b_ref, o_ref, acc_ref, *, num_classes):
    # a_ref:  [TM, TK]  bf16 tile of A_hat
    # xw_ref: [TK, CP]  bf16 tile of XW
    # b_ref:  [1,  CP]  f32 padded bias
    # o_ref:  [TM, CP]  f32 log-softmax output (padded lanes garbage, sliced off)
    # acc_ref:[TM, CP]  f32 VMEM accumulator (lives across the K grid axis)
    k = pl.program_id(1)

    @pl.when(k == 0)
    def _():
        acc_ref[...] = jnp.zeros_like(acc_ref)

    acc_ref[...] += jnp.dot(
        a_ref[...], xw_ref[...], preferred_element_type=jnp.float32
    )

    @pl.when(k == pl.num_programs(1) - 1)
    def _():
        tm, cp = acc_ref.shape
        z = acc_ref[...] + b_ref[...]                       # bias added once
        col = lax.broadcasted_iota(jnp.int32, (tm, cp), 1)
        z = jnp.where(col < num_classes, z, jnp.float32(-1e30))  # mask pad lanes
        m = jnp.max(z, axis=1, keepdims=True)
        shifted = z - m
        lse = jnp.log(jnp.sum(jnp.exp(shifted), axis=1, keepdims=True))
        o_ref[...] = (shifted - lse).astype(o_ref.dtype)


# ------------------------------- glue (JAX) ---------------------------------
def build_normalized_adjacency(edge_index, num_nodes, dtype=jnp.float32):
    """Dense A_hat = D^{-1/2} (A + I) D^{-1/2}, PyG gcn_norm convention."""
    src = edge_index[0]
    dst = edge_index[1]
    loop = jnp.arange(num_nodes, dtype=edge_index.dtype)
    src = jnp.concatenate([src, loop])
    dst = jnp.concatenate([dst, loop])
    ones = jnp.ones(src.shape[0], dtype=dtype)
    deg = jnp.zeros((num_nodes,), dtype=dtype).at[dst].add(ones)
    deg_inv_sqrt = jnp.where(deg > 0, 1.0 / jnp.sqrt(deg), 0.0)
    norm = deg_inv_sqrt[src] * deg_inv_sqrt[dst]
    # message from src aggregated into dst  =>  A_hat[dst, src] += norm
    a_hat = jnp.zeros((num_nodes, num_nodes), dtype=dtype).at[dst, src].add(norm)
    return a_hat


def sgc_forward(x, edge_index, weight_t, bias, *, tm=256, tk=512):
    """x: [N, F] f32, edge_index: [2, E] int32,
       weight_t: [F, C] f32, bias: [C] f32 -> [N, C] f32 log-probs."""
    n, f = x.shape
    c = weight_t.shape[1]

    a_hat = build_normalized_adjacency(edge_index, n, dtype=jnp.float32)

    # ---- tile selection (clamped to problem size, (8,128)-aligned) ----
    tm = min(tm, _round_up(n, 8))          # row tile of A_hat / output
    tk = min(tk, _round_up(n, 128))        # K tile (cols of A_hat)
    n_m = _round_up(n, tm)
    n_k = _round_up(n, tk)

    # ---- pad + cast streamed operands to bf16 (f32 accumulation in-kernel) ----
    a_pad = jnp.zeros((n_m, n_k), jnp.bfloat16).at[:n, :n].set(
        a_hat.astype(jnp.bfloat16))
    x_pad = jnp.zeros((n_k, f), jnp.bfloat16).at[:n, :].set(
        x.astype(jnp.bfloat16))
    w_pad = jnp.zeros((f, _CP), jnp.bfloat16).at[:, :c].set(
        weight_t.astype(jnp.bfloat16))
    b_pad = jnp.zeros((1, _CP), jnp.float32).at[0, :c].set(
        bias.astype(jnp.float32))

    # ---- kernel 1: XW = X @ W   (tiny; lane-dense [n_k, 128] bf16) ----
    xw = pl.pallas_call(
        xw_kernel,
        out_shape=jax.ShapeDtypeStruct((n_k, _CP), jnp.bfloat16),
        grid_spec=pltpu.PrefetchScalarGridSpec(
            num_scalar_prefetch=0,
            grid=(n_k // tk,),
            in_specs=[
                pl.BlockSpec((tk, f), lambda i: (i, 0)),
                pl.BlockSpec((f, _CP), lambda i: (0, 0)),
            ],
            out_specs=pl.BlockSpec((tk, _CP), lambda i: (i, 0)),
        ),
        compiler_params=pltpu.CompilerParams(
            dimension_semantics=("parallel",),
            vmem_limit_bytes=_VMEM_LIMIT,
        ),
    )(x_pad, w_pad)

    # ---- kernel 2: Z = A_hat @ XW + b, row-wise log_softmax ----
    out_padded = pl.pallas_call(
        functools.partial(sgc_agg_kernel, num_classes=c),
        out_shape=jax.ShapeDtypeStruct((n_m, _CP), jnp.float32),
        grid_spec=pltpu.PrefetchScalarGridSpec(
            num_scalar_prefetch=0,
            grid=(n_m // tm, n_k // tk),
            in_specs=[
                pl.BlockSpec((tm, tk), lambda i, k: (i, k)),
                pl.BlockSpec((tk, _CP), lambda i, k: (k, 0)),
                pl.BlockSpec((1, _CP), lambda i, k: (0, 0)),
            ],
            out_specs=pl.BlockSpec((tm, _CP), lambda i, k: (i, 0)),
            scratch_shapes=[pltpu.VMEM((tm, _CP), jnp.float32)],
        ),
        compiler_params=pltpu.CompilerParams(
            dimension_semantics=("parallel", "arbitrary"),
            vmem_limit_bytes=_VMEM_LIMIT,
        ),
    )(a_pad, xw, b_pad)

    return out_padded[:n, :c]


if __name__ == "__main__":
    # Small, deterministic problem: 16 nodes, 8 features, 4 classes.
    num_nodes = 16
    num_features = 8
    num_classes = 4
    num_edges = 32

    key = jax.random.PRNGKey(0)
    kx, ke_src, ke_dst, kw, kb = jax.random.split(key, 5)

    x = jax.random.normal(kx, (num_nodes, num_features), dtype=jnp.float32)
    src = jax.random.randint(ke_src, (num_edges,), 0, num_nodes, dtype=jnp.int32)
    dst = jax.random.randint(ke_dst, (num_edges,), 0, num_nodes, dtype=jnp.int32)
    edge_index = jnp.stack([src, dst], axis=0)  # [2, E]

    # Deterministic parameter init (torch Linear-style uniform bound).
    bound = 1.0 / jnp.sqrt(float(num_features))
    weight_t = jax.random.uniform(
        kw, (num_features, num_classes), minval=-bound, maxval=bound,
        dtype=jnp.float32)
    bias = jax.random.uniform(
        kb, (num_classes,), minval=-bound, maxval=bound, dtype=jnp.float32)

    out = sgc_forward(x, edge_index, weight_t, bias)
    out = jax.block_until_ready(out)

    assert out.shape == (num_nodes, num_classes)

    # Sanity 1: rows are log-probabilities -> exp(row) sums to 1 (softmax is f32).
    row_sums = jnp.exp(out).sum(axis=1)
    assert bool(jnp.allclose(row_sums, 1.0, atol=1e-4))

    # Sanity 2: matches pure-JAX f32 reference up to bf16 matmul error.
    a_hat_ref = build_normalized_adjacency(edge_index, num_nodes)
    ref = jax.nn.log_softmax(a_hat_ref @ x @ weight_t + bias, axis=1)
    assert bool(jnp.allclose(out, ref, atol=3e-2, rtol=3e-2))

    print("KERNEL_OK")
</pallas_src>

<mosaic_0001>
module attributes {stable_mosaic.version = 11 : i64} {
  func.func @xw_kernel(%arg0: i32, %arg1: memref<128x8xbf16, #tpu.memory_space<vmem>>, %arg2: memref<8x128xbf16, #tpu.memory_space<vmem>>, %arg3: memref<128x128xbf16, #tpu.memory_space<vmem>>) attributes {dimension_semantics = [#tpu.dimension_semantics<parallel>], iteration_bounds = array<i64: 1>, scalar_prefetch = 0 : i64, scratch_operands = 0 : i64, tpu.core_type = #tpu.core_type<tc>, window_params = [{transform_indices = @transform_0, window_bounds = array<i64: 128, 8>}, {pipeline_mode = #tpu.pipeline_mode<synchronous>, transform_indices = @transform_1, window_bounds = array<i64: 8, 128>}, {transform_indices = @transform_2, window_bounds = array<i64: 128, 128>}]} {
    %c0 = arith.constant 0 : index
    %c0_0 = arith.constant 0 : index
    %0 = vector.load %arg1[%c0, %c0_0] : memref<128x8xbf16, #tpu.memory_space<vmem>>, vector<128x8xbf16>
    %c0_1 = arith.constant 0 : index
    %c0_2 = arith.constant 0 : index
    %1 = vector.load %arg2[%c0_1, %c0_2] : memref<8x128xbf16, #tpu.memory_space<vmem>>, vector<8x128xbf16>
    %cst = arith.constant dense<0.000000e+00> : vector<128x128xf32>
    %2 = tpu.matmul %0, %1, %cst {dimension_numbers = #tpu.dot_dimension_numbers<[1], [0], [0], [1], [0, 0, 1, 1], [], []>} : vector<128x8xbf16>, vector<8x128xbf16>, vector<128x128xf32> -> vector<128x128xf32>
    %3 = arith.truncf %2 : vector<128x128xf32> to vector<128x128xbf16>
    %c0_3 = arith.constant 0 : index
    %c0_4 = arith.constant 0 : index
    %4 = vector.load %arg3[%c0_3, %c0_4] : memref<128x128xbf16, #tpu.memory_space<vmem>>, vector<128x128xbf16>
    tpu.vector_store %arg3[%c0_3, %c0_4], %3 {strides = array<i32>} : memref<128x128xbf16, #tpu.memory_space<vmem>>, vector<128x128xbf16>,
    return
  }
  func.func @transform_0(%arg0: i32) -> (i32, i32) {
    %c0_i32 = arith.constant 0 : i32
    %c0_i32_0 = arith.constant 0 : i32
    return %arg0, %c0_i32 : i32, i32
  }
  func.func @transform_1(%arg0: i32) -> (i32, i32) {
    %c0_i32 = arith.constant 0 : i32
    %c0_i32_0 = arith.constant 0 : i32
    %c0_i32_1 = arith.constant 0 : i32
    return %c0_i32, %c0_i32_0 : i32, i32
  }
  func.func @transform_2(%arg0: i32) -> (i32, i32) {
    %c0_i32 = arith.constant 0 : i32
    %c0_i32_0 = arith.constant 0 : i32
    return %arg0, %c0_i32 : i32, i32
  }
}

</mosaic_0001>

<bundles_post_ra>
// kernel: tpu_custom_call.1
= control target key start
LH: loop header
LB: loop body
LE: loop exit
PB: predicated region body
PF: predicated region fallthrough
CT: control target
= control target key end

     0   :  { %7 = vsyncpa [#allocation3], 0  ;;  %s601_s0 = inlined_call_operand.hbm [shape: bf16[128,8], index: 0, kind: input, shape index: {}]   ;;  %s602_s1 = inlined_call_operand.hbm [shape: bf16[8,128], index: 1, kind: input, shape index: {}]   ;;  %s603_s2 = inlined_call_operand.hbm [shape: bf16[128,128], index: 2, kind: output, shape index: {}]  }
   0x1   :  { %8 = vsyncpa [#allocation6], 0 }
   0x2   :  { %9 = vsyncpa [#allocation4], 0  ;;  %s531_s9 = smov [#allocation2]   ;;  %s459_s13 = scalar_lea.hbm %s601_s0, 1024 }
   0x3   :  { %s15_s10 = sshll.u32 %s531_s9, 4  ;;  %p460_p0 = scmp.ne.s32.totalorder %s601_s0, %s459_s13  ;;  %s16_s10 = int_to_ptr.vmem [resolvable:$true] %s15_s10 }
   0x4   :  { %p463_p1 = scmp.lt.u32.totalorder %s459_s13, %s601_s0 }
   0x6   :  { %p465_p2 = pnand %p463_p1, %p460_p0 }
   0x8   :  { %468 = shalt.err (!%p465_p2)
}
   0x9   :  { %s469_s18 = scalar_lea.vmem %s16_s10, 1024  ;;  %p474_p4 = scmp.lt.s32.totalorder %s16_s10, %s16_s10 }
   0xa   :  { %p470_p3 = scmp.ne.s32.totalorder %s16_s10, %s469_s18  ;;  %p475_p5 = scmp.lt.s32.totalorder %s469_s18, %s469_s18 }
   0xc   :  { %p476_p6 = por %p475_p5, %p474_p4 }
   0xe   :  { %p477_p7 = pnand %p476_p6, %p470_p3 }
  0x10   :  { %480 = shalt.err (!%p477_p7)
}
  0x11   :  { %s532_s19 = smov 64   ;;  %s533_s20 = smov 4  }
  0x12   :  { %21 = dma.hbm_to_vmem [thread:$0]  %s601_s0, 1024, %s16_s10, [#allocation3], %s532_s19, %s532_s19, %s533_s20  }
  0x13   :  { %s534_s23 = smov [#allocation5]   ;;  %s481_s27 = scalar_lea.hbm %s602_s1, 64 }
  0x14   :  { %s28_s24 = sshll.u32 %s534_s23, 4  ;;  %p482_p8 = scmp.ne.s32.totalorder %s602_s1, %s481_s27  ;;  %s29_s24 = int_to_ptr.vmem [resolvable:$true] %s28_s24 }
  0x15   :  { %p485_p9 = scmp.lt.u32.totalorder %s481_s27, %s602_s1 }
  0x17   :  { %p487_p10 = pnand %p485_p9, %p482_p8 }
  0x19   :  { %490 = shalt.err (!%p487_p10)
}
  0x1a   :  { %s491_s4 = scalar_lea.vmem %s29_s24, 64  ;;  %p496_p12 = scmp.lt.s32.totalorder %s29_s24, %s29_s24 }
  0x1b   :  { %p492_p11 = scmp.ne.s32.totalorder %s29_s24, %s491_s4  ;;  %p497_p13 = scmp.lt.s32.totalorder %s491_s4, %s491_s4 }
  0x1d   :  { %p498_p0 = por %p497_p13, %p496_p12 }
  0x1f   :  { %p499_p1 = pnand %p498_p0, %p492_p11 }
  0x21   :  { %502 = shalt.err (!%p499_p1)
}
  0x22   :  { %31 = dma.hbm_to_vmem [thread:$0]  %s602_s1, 64, %s29_s24, [#allocation6]  }
  0x23   :  { %525 = dma.done.wait [#allocation3], 1024  }
  0x24   :  { %526 = vsyncadd [#allocation3], 4294966272 }
  0x25   :  { %527 = dma.done.wait [#allocation6], 64  }
  0x26   :  { %528 = vsyncadd [#allocation6], 4294967232  ;;  %vm121_vm0 = vcmask 1043456   ;;  %vm96_vm1 = vcmask 64512   ;;  %v55_v0 = vld [vmem:[#allocation5] sm:$0xf] }
  0x27   :  { %444 = vmatprep.subr.msk.bf16.mxu0 %vm121_vm0, %v55_v0  ;;  %445 = vmatprep.subr.msk.bf16.mxu1 %vm121_vm0, %v55_v0  ;;  %v123_v1 = vsel %vm121_vm0, %v55_v0, 0  ;;  %v451_v2 = vld [vmem:[#allocation2] sm:$0xff]   ;;  %v453_v4 = vld [vmem:[#allocation2 + $0x8] sm:$0xff]   ;;  %v455_v6 = vld [vmem:[#allocation2 + $0x10] sm:$0xff]   ;;  %s535_s1 = smov [#allocation7]  }
  0x28   :  { %425 = vmatpush3.bf16.msra.mxu0 %v123_v1  ;;  %443 = vmatpush3.bf16.msra.mxu1 %v123_v1  ;;  %v452_v3 = vld [vmem:[#allocation2 + $0x20] sm:$0xff]   ;;  %v454_v5 = vld [vmem:[#allocation2 + $0x28] sm:$0xff]   ;;  %v456_v7 = vld [vmem:[#allocation2 + $0x30] sm:$0xff]   ;;  %s307_s6 = sshll.u32 %s535_s1, 4  ;;  %s308_s6 = int_to_ptr.vmem [resolvable:$true] %s307_s6 }
  0x29   :  { %426 = vmatprep.mubr.msk.bf16.mxu0 %vm96_vm1, %v451_v2  ;;  %434 = vmatprep.mubr.msk.bf16.mxu1 %vm96_vm1, %v452_v3  ;;  %v457_v8 = vld [vmem:[#allocation2 + $0x18] sm:$0xff]   ;;  %s503_s7 = scalar_lea.vmem %s308_s6, 1024  ;;  %p508_p3 = scmp.lt.s32.totalorder %s308_s6, %s308_s6 }
  0x2a   :  { %v458_v9 = vld [vmem:[#allocation2 + $0x38] sm:$0xff]   ;;  %p504_p2 = scmp.ne.s32.totalorder %s308_s6, %s503_s7  ;;  %p509_p4 = scmp.lt.s32.totalorder %s503_s7, %s503_s7 }
  0x2b   :  { %427 = vmatmul.mubr.msk.bf16.vlgmr.msra.gmra.mrb[0].mxu0 %vm96_vm1, %v453_v4  ;;  %435 = vmatmul.mubr.msk.bf16.vlgmr.msra.gmra.mrb[0].mxu1 %vm96_vm1, %v454_v5 }
  0x2c   :  { %430 = vmatprep.mubr.msk.bf16.mxu0 %vm96_vm1, %v455_v6  ;;  %438 = vmatprep.mubr.msk.bf16.mxu1 %vm96_vm1, %v456_v7  ;;  %p510_p5 = por %p509_p4, %p508_p3 }
  0x2e   :  { %p511_p6 = pnand %p510_p5, %p504_p2 }
  0x33   :  { %431 = vmatmul.mubr.msk.bf16.gmra.mrb[4].mxu0 %vm96_vm1, %v457_v8  ;;  %439 = vmatmul.mubr.msk.bf16.gmra.mrb[4].mxu1 %vm96_vm1, %v458_v9 }
  0xfe   :  { %v428_v10 = vpop.f32.mrb[0].mxu0  ;;  %v436_v11 = vpop.f32.mrb[0].mxu1 }
  0xff   :  { %v159_v12 = vpop.f32.mrb[1].mxu0  ;;  %v191_v13 = vpop.f32.mrb[1].mxu1 }
 0x100   :  { %v429_v14 = vpop.f32.mrb[2].mxu0  ;;  %v437_v16 = vpop.f32.mrb[2].mxu1 }
 0x101   :  { %v376_v15 = vpack.c.bf16 %v429_v14, %v428_v10  ;;  %v162_v17 = vpop.f32.mrb[3].mxu0  ;;  %v396_v18 = vpack.c.bf16 %v437_v16, %v436_v11  ;;  %v194_v20 = vpop.f32.mrb[3].mxu1 }
 0x102   :  { %v371_v19 = vpack.c.bf16 %v162_v17, %v159_v12  ;;  %v391_v21 = vpack.c.bf16 %v194_v20, %v191_v13 }
 0x103   :  { %408 = vst [vmem:[#allocation7 + $0x8] sm:$0xff] %v376_v15   ;;  %412 = vst [vmem:[#allocation7 + $0x28] sm:$0xff] %v396_v18  }
 0x104   :  { %372 = vst [vmem:[#allocation7] sm:$0xff] %v371_v19   ;;  %411 = vst [vmem:[#allocation7 + $0x20] sm:$0xff] %v391_v21  }
 0x106   :  { %v432_v22 = vpop.f32.mrb[4].mxu0  ;;  %v440_v23 = vpop.f32.mrb[4].mxu1 }
 0x107   :  { %v175_v24 = vpop.f32.mrb[5].mxu0  ;;  %v207_v25 = vpop.f32.mrb[5].mxu1 }
 0x108   :  { %v433_v26 = vpop.f32.mrb[6].mxu0  ;;  %v441_v28 = vpop.f32.mrb[6].mxu1 }
 0x109   :  { %v386_v27 = vpack.c.bf16 %v433_v26, %v432_v22  ;;  %v178_v29 = vpop.f32.mrb[7].mxu0  ;;  %v406_v30 = vpack.c.bf16 %v441_v28, %v440_v23  ;;  %v210_v32 = vpop.f32.mrb[7].mxu1 }
 0x10a   :  { %v381_v31 = vpack.c.bf16 %v178_v29, %v175_v24  ;;  %v401_v33 = vpack.c.bf16 %v210_v32, %v207_v25 }
 0x10b   :  { %410 = vst [vmem:[#allocation7 + $0x18] sm:$0xff] %v386_v27   ;;  %414 = vst [vmem:[#allocation7 + $0x38] sm:$0xff] %v406_v30  }
 0x10c   :  { %409 = vst [vmem:[#allocation7 + $0x10] sm:$0xff] %v381_v31   ;;  %413 = vst [vmem:[#allocation7 + $0x30] sm:$0xff] %v401_v33  }
 0x10d   :  { %514 = shalt.err (!%p511_p6)
}
 0x10e   :  { %s515_s10 = scalar_lea.hbm %s603_s2, 1024 }
 0x10f   :  { %p516_p7 = scmp.ne.s32.totalorder %s603_s2, %s515_s10  ;;  %p519_p8 = scmp.lt.u32.totalorder %s515_s10, %s603_s2 }
 0x111   :  { %p521_p9 = pnand %p519_p8, %p516_p7 }
 0x113   :  { %524 = shalt.err (!%p521_p9)
}
 0x114   :  { %313 = dma.vmem_to_hbm [thread:$0]  %s308_s6, 1024, %s603_s2, [#allocation4], %s532_s19, %s532_s19, %s533_s20  }
 0x115   :  { %529 = dma.done.wait [#allocation4], 1024  }
 0x116   :  { %530 = vsyncadd [#allocation4], 4294966272 }
 0x117   :  { %317 = vsyncpa [#allocation3], 1 }
 0x118   :  { %318 = vsyncpa [#allocation6], 1 }
 0x119   :  { %319 = vsyncpa [#allocation4], 1 }

</bundles_post_ra>
